<compile_context>
chip_gen: v5e
topology: v5e:2x2
jax: 0.10.0
libtpu: 0.0.40
codegen_flags: <defaults>
</compile_context>

<pallas_src>
import jax
import jax.numpy as jnp
from jax import lax
from jax.experimental import pallas as pl
from jax.experimental.pallas import tpu as pltpu


def _round_up(x, m):
    return (x + m - 1) // m * m


def branchnet_kernel(x_ref, w1_ref, b1_ref, w2_ref, b2_ref, w3_ref, b3_ref,
                     o_ref):
    # x_ref: (TB, D_in) -- native PyTorch layout, batch on sublanes.
    x = x_ref[...]
    w_dtype = w1_ref.dtype

    # Layer 1: contract the feature dim of both operands ("NT" matmul):
    #   (H, D_in) . (TB, D_in) -> (H, TB), f32 accumulation.
    # This flips the activations to batch-on-lanes without materializing x.T.
    h1 = lax.dot_general(
        w1_ref[...], x.astype(w_dtype),
        dimension_numbers=(((1,), (1,)), ((), ())),
        preferred_element_type=jnp.float32)
    h1 = jnp.maximum(h1 + b1_ref[...], 0.0)          # b1: (H, 1) lane-broadcast
    # Dropout(0.1): identity in inference mode.

    # Layer 2: (H, H) @ (H, TB) -> (H, TB) on the MXU, + ReLU.
    h2 = jnp.dot(w2_ref[...], h1.astype(w_dtype),
                 preferred_element_type=jnp.float32)
    h2 = jnp.maximum(h2 + b2_ref[...], 0.0)          # b2: (H, 1) lane-broadcast
    # Dropout(0.1): identity in inference mode.

    # Layer 3 (1 x H weight): VPU multiply + sublane (XLU) reduce instead of a
    # padded single-row MXU matmul.  w3_ref: (H, 1) f32 column.
    out = jnp.sum(w3_ref[...] * h2, axis=0, keepdims=True)   # (1, TB) f32
    o_ref[...] = (out + b3_ref[0]).astype(o_ref.dtype)       # lane-dense store


def branchnet_forward(x, params, *, tile_b=4096):
    """Fused BranchNet forward.

    x: (B, input_dim), f32 or bf16.  No wrapper-side copy of x is made: pass
       bf16 x to halve the dominant HBM read stream (f32 MXU accumulation and
       f32 elementwise math are kept; expect ~5e-2 abs tolerance vs f32).
    params: PyTorch layout (w1 (H,D), b1 (H,), w2 (H,H), b2 (H,), w3 (1,H),
       b3 (1,)).
    tile_b: batch tile (rounded to a multiple of 128).  Sweep 2048..8192 for
       large batches; it is automatically clamped so the grid has >= 2
       parallel steps (v7x megacore) whenever B allows.

    Returns (B, 1) float32.
    """
    w1, b1, w2, b2, w3, b3 = params
    B, D_in = x.shape
    H = w1.shape[0]

    # Batch-aware tile: multiple of 128 lanes, >= 2 grid steps when B > 128.
    half = _round_up(pl.cdiv(B, 2), 128)
    tb = max(128, min(_round_up(tile_b, 128), half))
    grid = (pl.cdiv(B, tb),)

    # Weights follow x.dtype (tiny casts); biases / layer-3 column stay f32.
    wdt = x.dtype
    w1c = w1.astype(wdt)
    w2c = w2.astype(wdt)
    w3c = w3.reshape(H, 1).astype(jnp.float32)
    b1c = b1.reshape(H, 1).astype(jnp.float32)
    b2c = b2.reshape(H, 1).astype(jnp.float32)
    b3c = b3.reshape(1).astype(jnp.float32)

    in_specs = [
        pl.BlockSpec((tb, D_in), lambda i: (i, 0)),           # x (native layout)
        pl.BlockSpec((H, D_in), lambda i: (0, 0)),            # w1
        pl.BlockSpec((H, 1), lambda i: (0, 0)),               # b1
        pl.BlockSpec((H, H), lambda i: (0, 0)),               # w2
        pl.BlockSpec((H, 1), lambda i: (0, 0)),               # b2
        pl.BlockSpec((H, 1), lambda i: (0, 0)),               # w3 column
        pl.BlockSpec(memory_space=pltpu.MemorySpace.SMEM),    # b3 scalar
    ]
    out_spec = pl.BlockSpec((1, tb), lambda i: (0, i))        # lane-dense row

    itemsize = jnp.dtype(wdt).itemsize
    flops = 2 * B * (D_in * H + H * H + H)
    bytes_accessed = (B * D_in * itemsize                     # x read
                      + B * 4                                 # output write
                      + (H * D_in + H * H) * itemsize         # w1, w2
                      + (3 * H + 1) * 4)                      # w3, b1, b2, b3

    out = pl.pallas_call(
        branchnet_kernel,
        out_shape=jax.ShapeDtypeStruct((1, B), jnp.float32),
        grid_spec=pltpu.PrefetchScalarGridSpec(
            num_scalar_prefetch=0,
            grid=grid,
            in_specs=in_specs,
            out_specs=out_spec,
        ),
        compiler_params=pltpu.CompilerParams(
            dimension_semantics=("parallel",)),
        cost_estimate=pl.CostEstimate(
            flops=flops, transcendentals=0, bytes_accessed=bytes_accessed),
    )(x, w1c, b1c, w2c, b2c, w3c, b3c)

    # (1, B) -> (B, 1): cheap reshape, no slicing (ragged edge handled by
    # masked stores inside the kernel).
    return out.reshape(B, 1)


def init_params(key, input_dim=6, hidden_dim=32):
    """Deterministic PyTorch-style init, (out_features, in_features) layout."""
    keys = jax.random.split(key, 6)

    def linear(kw, kb, fan_in, fan_out):
        bound = 1.0 / float(fan_in) ** 0.5
        w = jax.random.uniform(kw, (fan_out, fan_in), jnp.float32,
                               minval=-bound, maxval=bound)
        b = jax.random.uniform(kb, (fan_out,), jnp.float32,
                               minval=-bound, maxval=bound)
        return w, b

    w1, b1 = linear(keys[0], keys[1], input_dim, hidden_dim)
    w2, b2 = linear(keys[2], keys[3], hidden_dim, hidden_dim)
    w3, b3 = linear(keys[4], keys[5], hidden_dim, 1)
    return (w1, b1, w2, b2, w3, b3)


def branchnet_ref(x, params):
    w1, b1, w2, b2, w3, b3 = params
    h1 = jnp.maximum(x @ w1.T + b1, 0.0)
    h2 = jnp.maximum(h1 @ w2.T + b2, 0.0)
    return h2 @ w3.T + b3


if __name__ == "__main__":
    key = jax.random.PRNGKey(0)
    k_x, k_p, k_x2 = jax.random.split(key, 3)

    INPUT_DIM, HIDDEN = 6, 32
    params = init_params(k_p, INPUT_DIM, HIDDEN)

    # Small batch: single (partial) tile, masked edge reads/stores.
    B1 = 8
    x1 = jax.random.normal(k_x, (B1, INPUT_DIM), dtype=jnp.float32)
    ref1 = branchnet_ref(x1, params)
    out1 = jax.block_until_ready(branchnet_forward(x1, params))
    assert out1.shape == (B1, 1), out1.shape
    assert jnp.allclose(out1, ref1, atol=1e-5, rtol=1e-5), "f32 small mismatch"

    # Ragged multi-tile batch: exercises >=2 parallel grid steps (v7x
    # megacore path) plus a masked last tile (300 = 2*128 + 44).
    B2 = 300
    x2 = jax.random.normal(k_x2, (B2, INPUT_DIM), dtype=jnp.float32)
    ref2 = branchnet_ref(x2, params)
    out2 = jax.block_until_ready(branchnet_forward(x2, params, tile_b=128))
    assert out2.shape == (B2, 1), out2.shape
    assert jnp.allclose(out2, ref2, atol=1e-5, rtol=1e-5), "f32 ragged mismatch"

    # bf16 storage path: caller supplies bf16 x (no wrapper cast pass);
    # weights follow x.dtype, accumulation and elementwise math stay f32.
    out_bf16 = jax.block_until_ready(
        branchnet_forward(x1.astype(jnp.bfloat16), params))
    assert out_bf16.shape == (B1, 1), out_bf16.shape
    assert jnp.allclose(out_bf16, ref1, atol=5e-2, rtol=5e-2), "bf16 mismatch"

    print("KERNEL_OK")
</pallas_src>

<mosaic_0001>
module attributes {stable_mosaic.version = 11 : i64} {
  func.func @branchnet_kernel(%arg0: i32, %arg1: memref<128x6xf32, #tpu.memory_space<vmem>>, %arg2: memref<32x6xf32, #tpu.memory_space<vmem>>, %arg3: memref<32x1xf32, #tpu.memory_space<vmem>>, %arg4: memref<32x32xf32, #tpu.memory_space<vmem>>, %arg5: memref<32x1xf32, #tpu.memory_space<vmem>>, %arg6: memref<32x1xf32, #tpu.memory_space<vmem>>, %arg7: memref<1xf32, #tpu.memory_space<smem>>, %arg8: memref<1x128xf32, #tpu.memory_space<vmem>>) attributes {dimension_semantics = [#tpu.dimension_semantics<parallel>], iteration_bounds = array<i64: 1>, scalar_prefetch = 0 : i64, scratch_operands = 0 : i64, tpu.core_type = #tpu.core_type<tc>, window_params = [{transform_indices = @transform_0, window_bounds = array<i64: 128, 6>}, {pipeline_mode = #tpu.pipeline_mode<synchronous>, transform_indices = @transform_1, window_bounds = array<i64: 32, 6>}, {pipeline_mode = #tpu.pipeline_mode<synchronous>, transform_indices = @transform_2, window_bounds = array<i64: 32, 1>}, {pipeline_mode = #tpu.pipeline_mode<synchronous>, transform_indices = @transform_3, window_bounds = array<i64: 32, 32>}, {pipeline_mode = #tpu.pipeline_mode<synchronous>, transform_indices = @transform_4, window_bounds = array<i64: 32, 1>}, {pipeline_mode = #tpu.pipeline_mode<synchronous>, transform_indices = @transform_5, window_bounds = array<i64: 32, 1>}, {transform_indices = @transform_6, window_bounds = array<i64: 1>}, {transform_indices = @transform_7, window_bounds = array<i64: 1, 128>}]} {
    %c0 = arith.constant 0 : index
    %c0_0 = arith.constant 0 : index
    %0 = vector.load %arg1[%c0, %c0_0] : memref<128x6xf32, #tpu.memory_space<vmem>>, vector<128x6xf32>
    %c0_1 = arith.constant 0 : index
    %c0_2 = arith.constant 0 : index
    %1 = vector.load %arg2[%c0_1, %c0_2] : memref<32x6xf32, #tpu.memory_space<vmem>>, vector<32x6xf32>
    %cst = arith.constant dense<0.000000e+00> : vector<32x128xf32>
    %2 = tpu.matmul %1, %0, %cst {dimension_numbers = #tpu.dot_dimension_numbers<[1], [1], [0], [0], [0, 0, 1, 0], [], []>} : vector<32x6xf32>, vector<128x6xf32>, vector<32x128xf32> -> vector<32x128xf32>
    %c0_3 = arith.constant 0 : index
    %c0_4 = arith.constant 0 : index
    %3 = vector.load %arg3[%c0_3, %c0_4] : memref<32x1xf32, #tpu.memory_space<vmem>>, vector<32x1xf32>
    %4 = vector.broadcast %3 : vector<32x1xf32> to vector<32x128xf32>
    %5 = arith.addf %2, %4 : vector<32x128xf32>
    %cst_5 = arith.constant 0.000000e+00 : f32
    %6 = vector.broadcast %cst_5 : f32 to vector<32x128xf32>
    %7 = arith.maximumf %5, %6 : vector<32x128xf32>
    %c0_6 = arith.constant 0 : index
    %c0_7 = arith.constant 0 : index
    %8 = vector.load %arg4[%c0_6, %c0_7] : memref<32x32xf32, #tpu.memory_space<vmem>>, vector<32x32xf32>
    %cst_8 = arith.constant dense<0.000000e+00> : vector<32x128xf32>
    %9 = tpu.matmul %8, %7, %cst_8 {dimension_numbers = #tpu.dot_dimension_numbers<[1], [0], [0], [1], [0, 0, 1, 1], [], []>} : vector<32x32xf32>, vector<32x128xf32>, vector<32x128xf32> -> vector<32x128xf32>
    %c0_9 = arith.constant 0 : index
    %c0_10 = arith.constant 0 : index
    %10 = vector.load %arg5[%c0_9, %c0_10] : memref<32x1xf32, #tpu.memory_space<vmem>>, vector<32x1xf32>
    %11 = vector.broadcast %10 : vector<32x1xf32> to vector<32x128xf32>
    %12 = arith.addf %9, %11 : vector<32x128xf32>
    %cst_11 = arith.constant 0.000000e+00 : f32
    %13 = vector.broadcast %cst_11 : f32 to vector<32x128xf32>
    %14 = arith.maximumf %12, %13 : vector<32x128xf32>
    %c0_12 = arith.constant 0 : index
    %c0_13 = arith.constant 0 : index
    %15 = vector.load %arg6[%c0_12, %c0_13] : memref<32x1xf32, #tpu.memory_space<vmem>>, vector<32x1xf32>
    %16 = vector.broadcast %15 : vector<32x1xf32> to vector<32x128xf32>
    %17 = arith.mulf %16, %14 : vector<32x128xf32>
    %cst_14 = arith.constant dense<0.000000e+00> : vector<128xf32>
    %18 = vector.multi_reduction <add>, %17, %cst_14 [0] : vector<32x128xf32> to vector<128xf32>
    %19 = vector.shape_cast %18 : vector<128xf32> to vector<1x128xf32>
    %c0_15 = arith.constant 0 : index
    %20 = memref.load %arg7[%c0_15] : memref<1xf32, #tpu.memory_space<smem>>
    %21 = vector.broadcast %20 : f32 to vector<1x128xf32>
    %22 = arith.addf %19, %21 : vector<1x128xf32>
    %c0_16 = arith.constant 0 : index
    %c0_17 = arith.constant 0 : index
    %23 = vector.load %arg8[%c0_16, %c0_17] : memref<1x128xf32, #tpu.memory_space<vmem>>, vector<1x128xf32>
    tpu.vector_store %arg8[%c0_16, %c0_17], %22 {strides = array<i32>} : memref<1x128xf32, #tpu.memory_space<vmem>>, vector<1x128xf32>,
    return
  }
  func.func @transform_0(%arg0: i32) -> (i32, i32) {
    %c0_i32 = arith.constant 0 : i32
    %c0_i32_0 = arith.constant 0 : i32
    return %arg0, %c0_i32 : i32, i32
  }
  func.func @transform_1(%arg0: i32) -> (i32, i32) {
    %c0_i32 = arith.constant 0 : i32
    %c0_i32_0 = arith.constant 0 : i32
    %c0_i32_1 = arith.constant 0 : i32
    return %c0_i32, %c0_i32_0 : i32, i32
  }
  func.func @transform_2(%arg0: i32) -> (i32, i32) {
    %c0_i32 = arith.constant 0 : i32
    %c0_i32_0 = arith.constant 0 : i32
    %c0_i32_1 = arith.constant 0 : i32
    return %c0_i32, %c0_i32_0 : i32, i32
  }
  func.func @transform_3(%arg0: i32) -> (i32, i32) {
    %c0_i32 = arith.constant 0 : i32
    %c0_i32_0 = arith.constant 0 : i32
    %c0_i32_1 = arith.constant 0 : i32
    return %c0_i32, %c0_i32_0 : i32, i32
  }
  func.func @transform_4(%arg0: i32) -> (i32, i32) {
    %c0_i32 = arith.constant 0 : i32
    %c0_i32_0 = arith.constant 0 : i32
    %c0_i32_1 = arith.constant 0 : i32
    return %c0_i32, %c0_i32_0 : i32, i32
  }
  func.func @transform_5(%arg0: i32) -> (i32, i32) {
    %c0_i32 = arith.constant 0 : i32
    %c0_i32_0 = arith.constant 0 : i32
    %c0_i32_1 = arith.constant 0 : i32
    return %c0_i32, %c0_i32_0 : i32, i32
  }
  func.func @transform_6(%arg0: i32) -> i32 {
    %c0_i32 = arith.constant 0 : i32
    %c0_i32_0 = arith.constant 0 : i32
    return %c0_i32 : i32
  }
  func.func @transform_7(%arg0: i32) -> (i32, i32) {
    %c0_i32 = arith.constant 0 : i32
    %c0_i32_0 = arith.constant 0 : i32
    return %c0_i32, %arg0 : i32, i32
  }
}

</mosaic_0001>

<bundles_post_ra>
// kernel: tpu_custom_call.1
= control target key start
LH: loop header
LB: loop body
LE: loop exit
PB: predicated region body
PF: predicated region fallthrough
CT: control target
= control target key end

     0   :  { %vm72_vm0 = vcmask 48128   ;;  %s592_s0 = inlined_call_operand.vmem [shape: f32[8,6], index: 0, kind: input, shape index: {}]   ;;  %s593_s1 = inlined_call_operand.vmem [shape: f32[32,6], index: 1, kind: input, shape index: {}]   ;;  %s594_s2 = inlined_call_operand.vmem [shape: f32[32,1], index: 2, kind: input, shape index: {}]   ;;  %s595_s3 = inlined_call_operand.vmem [shape: f32[32,32], index: 3, kind: input, shape index: {}]   ;;  %s596_s4 = inlined_call_operand.vmem [shape: f32[32,1], index: 4, kind: input, shape index: {}]   ;;  %s597_s5 = inlined_call_operand.vmem [shape: f32[32,1], index: 5, kind: input, shape index: {}]   ;;  %s598_s6 = inlined_call_operand.<no memory space> [shape: f32[1], index: 6, kind: input, shape index: {}]   ;;  %s599_s7 = inlined_call_operand.hbm [shape: f32[1,8], index: 7, kind: output, shape index: {}]  }
   0x1   :  { %v43_v0 = vld [vmem:[%s592_s0 + $0x78] sm:$0xff]  ;;  %v42_v1 = vld [vmem:[%s592_s0 + $0x70] sm:$0xff] }
   0x2   :  { %322 = vmatpush.xpose.msk.msra.mxu3 %vm72_vm0, %v43_v0  ;;  %321 = vmatpush.xpose.msk.msra.mxu2 %vm72_vm0, %v43_v0 }
   0x3   :  { %297 = vmatpush.xpose.msk.msra.mxu0 %vm72_vm0, %v43_v0 }
   0x4   :  { %13 = vsyncpa [#allocation4], 0  ;;  %v41_v2 = vld [vmem:[%s592_s0 + $0x68] sm:$0xff]  ;;  %v40_v3 = vld [vmem:[%s592_s0 + $0x60] sm:$0xff]  ;;  %v384_v9 = vmov 0   ;;  %vm194_vm1 = vcmask 261120  }
   0x5   :  { %v39_v4 = vld [vmem:[%s592_s0 + $0x58] sm:$0xff]  ;;  %v38_v5 = vld [vmem:[%s592_s0 + $0x50] sm:$0xff]  ;;  %v37_v6 = vld [vmem:[%s592_s0 + $0x48] sm:$0xff]  ;;  %355 = vset.pattern.permute.xlu0 %v384_v9  ;;  %356 = vset.pattern.permute.xlu1 %v384_v9  ;;  %s385_s22 = smov [#allocation3]   ;;  %s288_s26 = sshll.u32 %s599_s7, 4  ;;  %s289_s26 = int_to_ptr.hbm [resolvable:$true] %s288_s26 }
   0x6   :  { %324 = vmatpush.xpose.msk.msra.mxu3 %vm72_vm0, %v42_v1  ;;  %323 = vmatpush.xpose.msk.msra.mxu2 %vm72_vm0, %v42_v1  ;;  %v51_v7 = vld [vmem:[%s594_s2 + $0x18] sm:$0xff]  ;;  %v36_v8 = vld [vmem:[%s592_s0 + $0x40] sm:$0xff]  ;;  %v49_v10 = vld [vmem:[%s594_s2 + $0x8] sm:$0xff]  ;;  %s286_s23 = sshll.u32 %s385_s22, 4  ;;  %s287_s23 = int_to_ptr.vmem [resolvable:$true] %s286_s23 }
   0x7   :  { %298 = vmatpush.xpose.msk.msra.mxu0 %vm72_vm0, %v42_v1  ;;  %69 = vperm.xlu0 %355, %v51_v7   ;;  %v35_v11 = vld [vmem:[%s592_s0 + $0x38] sm:$0xff]  ;;  %v50_v12 = vld [vmem:[%s594_s2 + $0x10] sm:$0xff]  ;;  %v48_v14 = vld [vmem:[%s594_s2] sm:$0xff] }
   0x8   :  { %357 = vset.pattern.permute.xlu2 %v384_v9  ;;  %59 = vperm.xlu1 %356, %v49_v10   ;;  %v34_v13 = vld [vmem:[%s592_s0 + $0x30] sm:$0xff]  ;;  %v33_v15 = vld [vmem:[%s592_s0 + $0x28] sm:$0xff]  ;;  %v32_v17 = vld [vmem:[%s592_s0 + $0x20] sm:$0xff] }
   0x9   :  { %v172_v16 = vld [vmem:[%s596_s4 + $0x10] sm:$0xff]  ;;  %v173_v18 = vld [vmem:[%s596_s4 + $0x18] sm:$0xff]  ;;  %v241_v20 = vld [vmem:[%s597_s5 + $0x8] sm:$0xff] }
   0xa   :  { %326 = vmatpush.xpose.msk.msra.mxu3 %vm72_vm0, %v41_v2  ;;  %325 = vmatpush.xpose.msk.msra.mxu2 %vm72_vm0, %v41_v2  ;;  %v31_v19 = vld [vmem:[%s592_s0 + $0x18] sm:$0xff]  ;;  %v30_v21 = vld [vmem:[%s592_s0 + $0x10] sm:$0xff]  ;;  %v29_v23 = vld [vmem:[%s592_s0 + $0x8] sm:$0xff] }
   0xb   :  { %299 = vmatpush.xpose.msk.msra.mxu0 %vm72_vm0, %v41_v2  ;;  %v242_v22 = vld [vmem:[%s597_s5 + $0x10] sm:$0xff]  ;;  %v28_v24 = vld [vmem:[%s592_s0] sm:$0xff]  ;;  %v45_v26 = vld [vmem:[%s593_s1 + $0x8] sm:$0xff] }
   0xc   :  { %v46_v25 = vld [vmem:[%s593_s1 + $0x10] sm:$0xff]  ;;  %v44_v27 = vld [vmem:[%s593_s1] sm:$0xff]  ;;  %v47_v28 = vld [vmem:[%s593_s1 + $0x18] sm:$0xff] }
   0xd   :  { %v170_v29 = vld [vmem:[%s596_s4] sm:$0xff]  ;;  %v171_v33 = vld [vmem:[%s596_s4 + $0x8] sm:$0xff]  ;;  %v243_v49 = vld [vmem:[%s597_s5 + $0x18] sm:$0xff] }
   0xe   :  { %328 = vmatpush.xpose.msk.msra.mxu3 %vm72_vm0, %v40_v3  ;;  %327 = vmatpush.xpose.msk.msra.mxu2 %vm72_vm0, %v40_v3  ;;  %v240_v43 = vld [vmem:[%s597_s5] sm:$0xff]  ;;  %v167_v50 = vld [vmem:[%s595_s3 + $0x8] sm:$0xff]  ;;  %v168_v51 = vld [vmem:[%s595_s3 + $0x10] sm:$0xff] }
   0xf   :  { %300 = vmatpush.xpose.msk.msra.mxu0 %vm72_vm0, %v40_v3  ;;  %64 = vperm.xlu0 %355, %v50_v12   ;;  %v166_v48 = vld [vmem:[%s595_s3] sm:$0xff]  ;;  %v169_v52 = vld [vmem:[%s595_s3 + $0x18] sm:$0xff] }
  0x10   :  { %54 = vperm.xlu1 %356, %v48_v14   ;;  %176 = vperm.xlu2 %357, %v170_v29  }
  0x12   :  { %330 = vmatpush.xpose.msk.msra.mxu3 %vm72_vm0, %v39_v4  ;;  %329 = vmatpush.xpose.msk.msra.mxu2 %vm72_vm0, %v39_v4 }
  0x13   :  { %301 = vmatpush.xpose.msk.msra.mxu0 %vm72_vm0, %v39_v4 }
  0x16   :  { %332 = vmatpush.xpose.msk.msra.mxu3 %vm72_vm0, %v38_v5  ;;  %331 = vmatpush.xpose.msk.msra.mxu2 %vm72_vm0, %v38_v5 }
  0x17   :  { %302 = vmatpush.xpose.msk.msra.mxu0 %vm72_vm0, %v38_v5  ;;  %186 = vperm.xlu0 %355, %v172_v16  }
  0x18   :  { %191 = vperm.xlu1 %356, %v173_v18   ;;  %181 = vperm.xlu2 %357, %v171_v33  }
  0x1a   :  { %334 = vmatpush.xpose.msk.msra.mxu3 %vm72_vm0, %v37_v6  ;;  %333 = vmatpush.xpose.msk.msra.mxu2 %vm72_vm0, %v37_v6 }
  0x1b   :  { %303 = vmatpush.xpose.msk.msra.mxu0 %vm72_vm0, %v37_v6 }
  0x1e   :  { %336 = vmatpush.xpose.msk.msra.mxu3 %vm72_vm0, %v36_v8  ;;  %335 = vmatpush.xpose.msk.msra.mxu2 %vm72_vm0, %v36_v8 }
  0x1f   :  { %304 = vmatpush.xpose.msk.msra.mxu0 %vm72_vm0, %v36_v8  ;;  %251 = vperm.xlu0 %355, %v241_v20  }
  0x20   :  { %256 = vperm.xlu1 %356, %v242_v22   ;;  %246 = vperm.xlu2 %357, %v240_v43  }
  0x22   :  { %338 = vmatpush.xpose.msk.msra.mxu3 %vm72_vm0, %v35_v11  ;;  %337 = vmatpush.xpose.msk.msra.mxu2 %vm72_vm0, %v35_v11 }
  0x23   :  { %305 = vmatpush.xpose.msk.msra.mxu0 %vm72_vm0, %v35_v11 }
  0x26   :  { %340 = vmatpush.xpose.msk.msra.mxu3 %vm72_vm0, %v34_v13  ;;  %339 = vmatpush.xpose.msk.msra.mxu2 %vm72_vm0, %v34_v13 }
  0x27   :  { %306 = vmatpush.xpose.msk.msra.mxu0 %vm72_vm0, %v34_v13 }
  0x28   :  { %261 = vperm.xlu2 %357, %v243_v49  }
  0x2a   :  { %342 = vmatpush.xpose.msk.msra.mxu3 %vm72_vm0, %v33_v15  ;;  %341 = vmatpush.xpose.msk.msra.mxu2 %vm72_vm0, %v33_v15 }
  0x2b   :  { %307 = vmatpush.xpose.msk.msra.mxu0 %vm72_vm0, %v33_v15 }
  0x2e   :  { %344 = vmatpush.xpose.msk.msra.mxu3 %vm72_vm0, %v32_v17  ;;  %343 = vmatpush.xpose.msk.msra.mxu2 %vm72_vm0, %v32_v17 }
  0x2f   :  { %308 = vmatpush.xpose.msk.msra.mxu0 %vm72_vm0, %v32_v17 }
  0x32   :  { %346 = vmatpush.xpose.msk.msra.mxu3 %vm72_vm0, %v31_v19  ;;  %345 = vmatpush.xpose.msk.msra.mxu2 %vm72_vm0, %v31_v19 }
  0x33   :  { %309 = vmatpush.xpose.msk.msra.mxu0 %vm72_vm0, %v31_v19 }
  0x36   :  { %348 = vmatpush.xpose.msk.msra.mxu3 %vm72_vm0, %v30_v21  ;;  %347 = vmatpush.xpose.msk.msra.mxu2 %vm72_vm0, %v30_v21 }
  0x37   :  { %310 = vmatpush.xpose.msk.msra.mxu0 %vm72_vm0, %v30_v21  ;;  %v278_v21 = vstv %s598_s6 }
  0x3a   :  { %350 = vmatpush.xpose.msk.msra.mxu3 %vm72_vm0, %v29_v23  ;;  %349 = vmatpush.xpose.msk.msra.mxu2 %vm72_vm0, %v29_v23 }
  0x3b   :  { %311 = vmatpush.xpose.msk.msra.mxu0 %vm72_vm0, %v29_v23 }
  0x3e   :  { %352 = vmatpush.xpose.msk.msra.mxu3 %vm72_vm0, %v28_v24  ;;  %351 = vmatpush.xpose.msk.msra.mxu2 %vm72_vm0, %v28_v24 }
  0x3f   :  { %312 = vmatpush.xpose.msk.msra.mxu0 %vm72_vm0, %v28_v24 }
  0x41   :  { %315 = vmatmul.msk.f32.vlgmr.msra.gmra.mxu3 %vm72_vm0, %v46_v25  ;;  %314 = vmatmul.msk.f32.vlgmr.msra.gmra.mxu2 %vm72_vm0, %v45_v26 }
  0x42   :  { %313 = vmatmul.msk.f32.vlgmr.msra.gmra.mxu0 %vm72_vm0, %v44_v27 }
  0x49   :  { %316 = vmatmul.msk.f32.gmra.mxu3 %vm72_vm0, %v47_v28 }
  0x6a   :  { %v177_v53 = vpop.permute.xlu2 %176 }
  0x72   :  { %v182_v55 = vpop.permute.xlu2 %181 }
  0x79   :  { %v70_v30 = vpop.permute.xlu0 %69 }
  0x7a   :  { %v60_v32 = vpop.permute.xlu1 %59  ;;  %v247_v63 = vpop.permute.xlu2 %246 }
  0x81   :  { %v65_v34 = vpop.permute.xlu0 %64 }
  0x82   :  { %v55_v42 = vpop.permute.xlu1 %54  ;;  %v262_v12 = vpop.permute.xlu2 %261 }
  0x89   :  { %v187_v57 = vpop.permute.xlu0 %186 }
  0x8a   :  { %v192_v58 = vpop.permute.xlu1 %191 }
  0x91   :  { %v252_v3 = vpop.permute.xlu0 %251 }
  0x92   :  { %v257_v5 = vpop.permute.xlu1 %256 }
  0xbf   :  { %v150_v39 = vpop.f32.mrf.mxu0 }
  0xc0   :  { %v151_v45 = vadd.f32 %v150_v39, %v55_v42 }
  0xc2   :  { %v162_v47 = vmax.f32 %v151_v45, 0.0 }
  0xc4   :  { %v156_v31 = vpop.f32.mrf.mxu3  ;;  %v153_v35 = vpop.f32.mrf.mxu2 }
  0xc5   :  { %v157_v37 = vadd.f32 %v156_v31, %v65_v34  ;;  %v154_v40 = vadd.f32 %v153_v35, %v60_v32 }
  0xc7   :  { %v164_v44 = vmax.f32 %v157_v37, 0.0  ;;  %v163_v46 = vmax.f32 %v154_v40, 0.0 }
  0xcc   :  { %v159_v36 = vpop.f32.mrf.mxu3 }
  0xcd   :  { %v160_v38 = vadd.f32 %v159_v36, %v70_v30 }
  0xcf   :  { %v165_v41 = vmax.f32 %v160_v38, 0.0 }
  0xd1   :  { %219 = vmatpush.msra.mxu1 %v165_v41 }
  0xd3   :  { %220 = vmatpush.msra.mxu1 %v164_v44 }
  0xd5   :  { %221 = vmatpush.msra.mxu1 %v163_v46 }
  0xd7   :  { %222 = vmatpush.msra.mxu1 %v162_v47 }
  0xd8   :  { %317 = vmatmul.msk.f32.vlgmr.msra.gmra.mxu1 %vm194_vm1, %v166_v48 }
  0xe0   :  { %318 = vmatmul.msk.f32.gmra.mxu1 %vm194_vm1, %v167_v50 }
  0xe8   :  { %319 = vmatmul.msk.f32.gmra.mxu1 %vm194_vm1, %v168_v51 }
  0xf0   :  { %320 = vmatmul.msk.f32.gmra.mxu1 %vm194_vm1, %v169_v52 }
 0x155   :  { %v224_v54 = vpop.f32.mrf.mxu1 }
 0x156   :  { %v225_v61 = vadd.f32 %v224_v54, %v177_v53 }
 0x158   :  { %v236_v1 = vmax.f32 %v225_v61, 0.0 }
 0x15a   :  { %v264_v7 = vmul.f32 %v247_v63, %v236_v1 }
 0x15d   :  { %v227_v56 = vpop.f32.mrf.mxu1 }
 0x15e   :  { %v228_v59 = vadd.f32 %v227_v56, %v182_v55 }
 0x160   :  { %v237_v0 = vmax.f32 %v228_v59, 0.0 }
 0x162   :  { %v265_v4 = vmul.f32 %v252_v3, %v237_v0 }
 0x164   :  { %v268_v10 = vadd.f32 %v265_v4, %v264_v7 }
 0x165   :  { %v230_v60 = vpop.f32.mrf.mxu1 }
 0x166   :  { %v231_v62 = vadd.f32 %v230_v60, %v187_v57 }
 0x168   :  { %v238_v2 = vmax.f32 %v231_v62, 0.0 }
 0x16a   :  { %v266_v8 = vmul.f32 %v257_v5, %v238_v2 }
 0x16c   :  { %v269_v13 = vadd.f32 %v268_v10, %v266_v8 }
 0x16d   :  { %v233_v6 = vpop.f32.mrf.mxu1 }
 0x16e   :  { %v234_v9 = vadd.f32 %v233_v6, %v192_v58 }
 0x170   :  { %v239_v11 = vmax.f32 %v234_v9, 0.0 }
 0x172   :  { %v267_v14 = vmul.f32 %v262_v12, %v239_v11 }
 0x174   :  { %v270_v15 = vadd.f32 %v269_v13, %v267_v14 }
 0x176   :  { %v271_v16 = vrot.slane %v270_v15, 4 }
 0x178   :  { %v272_v17 = vadd.f32 %v271_v16, %v270_v15 }
 0x17a   :  { %v273_v18 = vrot.slane %v272_v17, 2 }
 0x17c   :  { %v274_v19 = vadd.f32 %v273_v18, %v272_v17 }
 0x17e   :  { %v275_v20 = vrot.slane %v274_v19, 1 }
 0x180   :  { %v276_v22 = vadd.f32 %v275_v20, %v274_v19 }
 0x182   :  { %v279_v23 = vadd.f32 %v278_v21, %v276_v22 }
 0x184   :  { %280 = vst [vmem:[#allocation3] sm:$0x1] %v279_v23 }
 0x185   :  { %291 = dma.vmem_to_hbm [thread:$0]  %s287_s23, 16, %s289_s26, [#allocation4]  }
 0x186   :  { %382 = dma.done.wait [#allocation4], 16  }
 0x187   :  { %383 = vsyncadd [#allocation4], 4294967280 }
 0x188   :  { %296 = vsyncpa [#allocation4], 1 }

</bundles_post_ra>
